<compile_context>
chip_gen: v7x
topology: tpu7x:2x2x1
jax: 0.10.0
libtpu: 0.0.40
codegen_flags: <defaults>
</compile_context>

<pallas_src>
import functools

import jax
import jax.numpy as jnp
from jax.experimental import pallas as pl
from jax.experimental.pallas import tpu as pltpu

_LANE = 128     # lane granule for N / K tiles
_SUBLANE = 8    # sublane granule for M tiles


def _round_up(x, m):
    return ((x + m - 1) // m) * m


def _pick_tile(padded_dim, cap, granule):
    """Largest multiple of `granule` (<= cap) dividing the granule-padded dim."""
    if padded_dim <= cap:
        return padded_dim
    t = (cap // granule) * granule
    while t > granule and padded_dim % t:
        t -= granule
    return t  # granule always divides padded_dim


def _vmem_capacity_bytes():
    """Physical VMEM of the attached TPU; conservative (v7x) fallback."""
    fallback = 64 * 1024 * 1024
    try:
        info = pltpu.get_tpu_info()
        return int(getattr(info, "vmem_capacity_bytes", fallback))
    except Exception:
        return fallback


def _linear_single_k_kernel(x_ref, w_ref, b_ref, o_ref, *, compute_dtype):
    # x_ref: (tm, tk) -- history axis already squeezed by the BlockSpec.
    # Single K step: no scratch accumulator, no epilogue add.
    x = x_ref[...]
    w = w_ref[...]
    if compute_dtype is not None:
        x = x.astype(compute_dtype)   # no-op if already compute_dtype
        w = w.astype(compute_dtype)
    acc = jnp.dot(x, w, preferred_element_type=jnp.float32)
    o_ref[...] = (acc + b_ref[...].astype(jnp.float32)).astype(o_ref.dtype)


def _linear_multi_k_kernel(x_ref, w_ref, b_ref, o_ref, acc_ref, *, compute_dtype):
    k = pl.program_id(2)

    @pl.when(k == 0)
    def _():
        # Seed the accumulator with the broadcast bias: removes the separate
        # zero-store and the epilogue bias add.
        acc_ref[...] = jnp.broadcast_to(
            b_ref[...].astype(jnp.float32), acc_ref.shape)

    x = x_ref[...]
    w = w_ref[...]
    if compute_dtype is not None:
        x = x.astype(compute_dtype)
        w = w.astype(compute_dtype)
    acc_ref[...] += jnp.dot(x, w, preferred_element_type=jnp.float32)

    @pl.when(k == pl.num_programs(2) - 1)
    def _():
        o_ref[...] = acc_ref[...].astype(o_ref.dtype)


def flat_history_forward(x, w, b, *, compute_dtype=jnp.bfloat16,
                         out_dtype=jnp.float32, tile_caps=None):
    """FlatHistory.forward: squeeze the history dim (must be size 1), then run
    the wrapped linear model y = x2d @ W + b inside a tiled Pallas kernel.

    x: (B, 1, F), w: (F, H), b: (1, H).  Returns (B, H) in `out_dtype`
    (pass out_dtype=jnp.bfloat16 to halve output writeback when the consumer
    accepts it).  Operands are cast to `compute_dtype` inside the kernel right
    before the MXU dot (pass None for exact-f32 math); accumulation is f32.
    `tile_caps=(tm_cap, tn_cap, tk_cap)` overrides the generation defaults.
    """
    assert x.ndim == 3 and x.shape[1] == 1, \
        "FlatHistory requires the history axis (dim 1) to be size 1"
    B, _, F = x.shape
    Fw, H = w.shape
    assert F == Fw and b.shape == (1, H)

    # --- generation-aware tile caps ---------------------------------------
    vmem = _vmem_capacity_bytes()
    big_vmem = vmem >= 96 * 1024 * 1024        # v5e / v6e (128 MiB)
    tm_cap = 512
    tn_cap = 2048 if big_vmem else 1024
    tk_cap = 2048 if big_vmem else 1024
    vmem_limit = (96 if big_vmem else 48) * 1024 * 1024
    if tile_caps is not None:
        tm_cap, tn_cap, tk_cap = tile_caps

    Bp = _round_up(B, _SUBLANE)
    Fp = _round_up(F, _LANE)
    Hp = _round_up(H, _LANE)

    tm = _pick_tile(Bp, tm_cap, _SUBLANE)
    tn = _pick_tile(Hp, tn_cap, _LANE)
    tk = _pick_tile(Fp, tk_cap, _LANE)

    # v7x (2 TensorCores): make sure the parallel grid has >= 2 blocks so the
    # second core isn't idle.  Prefer splitting N; fall back to M; give up if
    # neither splits cleanly (tiny problems).
    if not big_vmem and (Bp // tm) * (Hp // tn) < 2:
        cand = (Hp // 2 // _LANE) * _LANE
        while cand >= _LANE and Hp % cand:
            cand -= _LANE
        if cand >= _LANE and Hp // cand >= 2:
            tn = cand
        else:
            cand = (Bp // 2 // _SUBLANE) * _SUBLANE
            while cand >= _SUBLANE and Bp % cand:
                cand -= _SUBLANE
            if cand >= _SUBLANE and Bp // cand >= 2:
                tm = cand

    # Zero-pad awkward shapes to lane/sublane-aligned tiles (no-op for aligned
    # shapes).  Zero K columns contribute nothing to the dot; padded output
    # rows/cols are sliced off below.
    if (Bp, Fp) != (B, F):
        x = jnp.pad(x, ((0, Bp - B), (0, 0), (0, Fp - F)))
    if (Fp, Hp) != (F, H):
        w = jnp.pad(w, ((0, Fp - F), (0, Hp - H)))
    if Hp != H:
        b = jnp.pad(b, ((0, 0), (0, Hp - H)))

    gm, gn, gk = Bp // tm, Hp // tn, Fp // tk
    grid = (gm, gn, gk)

    # Actual HBM traffic: x is streamed once per N tile, W once per M tile.
    out_itemsize = jnp.dtype(out_dtype).itemsize
    bytes_accessed = (gn * Bp * Fp * x.dtype.itemsize
                      + gm * Fp * Hp * w.dtype.itemsize
                      + gm * gn * tn * b.dtype.itemsize
                      + Bp * Hp * out_itemsize)

    in_specs = [
        # Squeeze the history axis inside the BlockSpec: kernel sees (tm, tk).
        pl.BlockSpec((tm, pl.Squeezed(), tk), lambda i, j, k: (i, 0, k)),
        pl.BlockSpec((tk, tn), lambda i, j, k: (k, j)),
        pl.BlockSpec((1, tn), lambda i, j, k: (0, j)),
    ]
    out_spec = pl.BlockSpec((tm, tn), lambda i, j, k: (i, j))

    if gk == 1:
        kernel = functools.partial(_linear_single_k_kernel,
                                   compute_dtype=compute_dtype)
        scratch = []
    else:
        kernel = functools.partial(_linear_multi_k_kernel,
                                   compute_dtype=compute_dtype)
        scratch = [pltpu.VMEM((tm, tn), jnp.float32)]

    out = pl.pallas_call(
        kernel,
        out_shape=jax.ShapeDtypeStruct((Bp, Hp), out_dtype),
        grid_spec=pltpu.PrefetchScalarGridSpec(
            num_scalar_prefetch=0,
            grid=grid,
            in_specs=in_specs,
            out_specs=out_spec,
            scratch_shapes=scratch,
        ),
        compiler_params=pltpu.CompilerParams(
            dimension_semantics=("parallel", "parallel", "arbitrary"),
            vmem_limit_bytes=vmem_limit,
        ),
        cost_estimate=pl.CostEstimate(
            flops=2 * Bp * Fp * Hp,
            transcendentals=0,
            bytes_accessed=bytes_accessed,
        ),
    )(x, w, b)

    if (Bp, Hp) != (B, H):
        out = out[:B, :H]
    return out


# TODO(synk): FlatHistory.log/.reset only delegate to the wrapped nn.Module and
# involve no forward-pass compute; they have no Pallas equivalent.
# TODO(synk): optional fp8 weight quantization for the v7x MXU is not done
# (not a drop-in numerics change for the wrapped model).


if __name__ == "__main__":
    key = jax.random.PRNGKey(0)
    kx, kw, kb = jax.random.split(key, 3)

    # ---- "model construction": parameters persisted once as bf16 (no per-
    # ---- forward wrapper cast pass), bias stays f32.
    B, HIST, F, H = 8, 1, 128, 128
    x = jax.random.normal(kx, (B, HIST, F), dtype=jnp.float32)
    w_f32 = jax.random.normal(kw, (F, H), dtype=jnp.float32) * 0.02
    b = jax.random.normal(kb, (1, H), dtype=jnp.float32) * 0.1
    w_bf16 = w_f32.astype(jnp.bfloat16)

    # 1) Main path: bf16 weights, single-K fast kernel.
    y = jax.block_until_ready(flat_history_forward(x, w_bf16, b))
    assert y.shape == (B, H)
    x2d = x.reshape(B, F)
    y_ref_bf16 = jnp.dot(x2d.astype(jnp.bfloat16), w_bf16,
                         preferred_element_type=jnp.float32) + b
    assert jnp.allclose(y, y_ref_bf16, atol=2e-3, rtol=2e-3)
    y_ref_f32 = x2d @ w_f32 + b
    assert jnp.allclose(y, y_ref_f32, atol=5e-2, rtol=5e-2)

    # 2) Multi-K accumulator path (tile caps overridden so gk > 1).
    B2, F2, H2 = 16, 256, 256
    k2a, k2b, k2c = jax.random.split(jax.random.PRNGKey(1), 3)
    x2 = jax.random.normal(k2a, (B2, 1, F2), dtype=jnp.float32)
    w2 = (jax.random.normal(k2b, (F2, H2), dtype=jnp.float32) * 0.02
          ).astype(jnp.bfloat16)
    b2 = jax.random.normal(k2c, (1, H2), dtype=jnp.float32) * 0.1
    y2 = jax.block_until_ready(
        flat_history_forward(x2, w2, b2, tile_caps=(8, 128, 128)))
    y2_ref = x2.reshape(B2, F2) @ w2.astype(jnp.float32) + b2
    assert y2.shape == (B2, H2)
    assert jnp.allclose(y2, y2_ref, atol=5e-2, rtol=5e-2)

    # 3) Non-lane-aligned shapes (exercise padding + output slice).
    B3, F3, H3 = 5, 200, 100
    k3a, k3b, k3c = jax.random.split(jax.random.PRNGKey(2), 3)
    x3 = jax.random.normal(k3a, (B3, 1, F3), dtype=jnp.float32)
    w3 = (jax.random.normal(k3b, (F3, H3), dtype=jnp.float32) * 0.02
          ).astype(jnp.bfloat16)
    b3 = jax.random.normal(k3c, (1, H3), dtype=jnp.float32) * 0.1
    y3 = jax.block_until_ready(flat_history_forward(x3, w3, b3))
    y3_ref = x3.reshape(B3, F3) @ w3.astype(jnp.float32) + b3
    assert y3.shape == (B3, H3)
    assert jnp.allclose(y3, y3_ref, atol=5e-2, rtol=5e-2)

    print("KERNEL_OK")
</pallas_src>

<mosaic_0001>
module attributes {stable_mosaic.version = 11 : i64} {
  func.func @_linear_single_k_kernel(%arg0: i32, %arg1: i32, %arg2: i32, %arg3: memref<8x1x128xf32, #tpu.memory_space<vmem>>, %arg4: memref<128x128xbf16, #tpu.memory_space<vmem>>, %arg5: memref<1x128xf32, #tpu.memory_space<vmem>>, %arg6: memref<8x128xf32, #tpu.memory_space<vmem>>) attributes {dimension_semantics = [#tpu.dimension_semantics<parallel>, #tpu.dimension_semantics<parallel>, #tpu.dimension_semantics<arbitrary>], iteration_bounds = array<i64: 1, 1, 1>, scalar_prefetch = 0 : i64, scratch_operands = 0 : i64, tpu.core_type = #tpu.core_type<tc>, window_params = [{transform_indices = @transform_0, window_bounds = array<i64: 8, 1, 128>}, {transform_indices = @transform_1, window_bounds = array<i64: 128, 128>}, {transform_indices = @transform_2, window_bounds = array<i64: 1, 128>}, {transform_indices = @transform_3, window_bounds = array<i64: 8, 128>}]} {
    %c0 = arith.constant 0 : index
    %c0_0 = arith.constant 0 : index
    %c0_1 = arith.constant 0 : index
    %0 = vector.load %arg3[%c0, %c0_0, %c0_1] : memref<8x1x128xf32, #tpu.memory_space<vmem>>, vector<8x1x128xf32>
    %1 = vector.shape_cast %0 : vector<8x1x128xf32> to vector<8x128xf32>
    %c0_2 = arith.constant 0 : index
    %c0_3 = arith.constant 0 : index
    %2 = vector.load %arg4[%c0_2, %c0_3] : memref<128x128xbf16, #tpu.memory_space<vmem>>, vector<128x128xbf16>
    %3 = arith.truncf %1 : vector<8x128xf32> to vector<8x128xbf16>
    %cst = arith.constant dense<0.000000e+00> : vector<8x128xf32>
    %4 = tpu.matmul %3, %2, %cst {dimension_numbers = #tpu.dot_dimension_numbers<[1], [0], [0], [1], [0, 0, 1, 1], [], []>} : vector<8x128xbf16>, vector<128x128xbf16>, vector<8x128xf32> -> vector<8x128xf32>
    %c0_4 = arith.constant 0 : index
    %c0_5 = arith.constant 0 : index
    %5 = vector.load %arg5[%c0_4, %c0_5] : memref<1x128xf32, #tpu.memory_space<vmem>>, vector<1x128xf32>
    %6 = vector.broadcast %5 : vector<1x128xf32> to vector<8x128xf32>
    %7 = arith.addf %4, %6 : vector<8x128xf32>
    %c0_6 = arith.constant 0 : index
    %c0_7 = arith.constant 0 : index
    %8 = vector.load %arg6[%c0_6, %c0_7] : memref<8x128xf32, #tpu.memory_space<vmem>>, vector<8x128xf32>
    tpu.vector_store %arg6[%c0_6, %c0_7], %7 {strides = array<i32>} : memref<8x128xf32, #tpu.memory_space<vmem>>, vector<8x128xf32>,
    return
  }
  func.func @transform_0(%arg0: i32, %arg1: i32, %arg2: i32) -> (i32, i32, i32) {
    %c0_i32 = arith.constant 0 : i32
    %c0_i32_0 = arith.constant 0 : i32
    return %arg0, %c0_i32, %arg2 : i32, i32, i32
  }
  func.func @transform_1(%arg0: i32, %arg1: i32, %arg2: i32) -> (i32, i32) {
    %c0_i32 = arith.constant 0 : i32
    return %arg2, %arg1 : i32, i32
  }
  func.func @transform_2(%arg0: i32, %arg1: i32, %arg2: i32) -> (i32, i32) {
    %c0_i32 = arith.constant 0 : i32
    %c0_i32_0 = arith.constant 0 : i32
    return %c0_i32, %arg1 : i32, i32
  }
  func.func @transform_3(%arg0: i32, %arg1: i32, %arg2: i32) -> (i32, i32) {
    %c0_i32 = arith.constant 0 : i32
    return %arg0, %arg1 : i32, i32
  }
}

</mosaic_0001>

<bundles_post_ra>
// kernel: tpu_custom_call.1
= control target key start
LH: loop header
LB: loop body
LE: loop exit
PB: predicated region body
PF: predicated region fallthrough
CT: control target
= control target key end

     0   :  { %8 = vsyncpa [#allocation3], 0  ;;  %s432_s0 = inlined_call_operand.hbm [shape: f32[8,1,128], index: 0, kind: input, shape index: {}]   ;;  %s433_s1 = inlined_call_operand.hbm [shape: bf16[128,128], index: 1, kind: input, shape index: {}]   ;;  %s434_s2 = inlined_call_operand.vmem [shape: f32[1,128], index: 2, kind: input, shape index: {}]   ;;  %s435_s3 = inlined_call_operand.hbm [shape: f32[8,128], index: 3, kind: output, shape index: {}]  }
   0x1   :  { %9 = vsyncpa [#allocation6], 0 }
   0x2   :  { %10 = vsyncpa [#allocation4], 0  ;;  %s354_s12 = smov [#allocation2]   ;;  %s282_s16 = scalar_lea.hbm %s432_s0, 128 }
   0x3   :  { %s16_s13 = sshll.u32 %s354_s12, 4  ;;  %p283_p0 = scmp.ne.s32.totalorder %s432_s0, %s282_s16  ;;  %s17_s13 = int_to_ptr.vmem [resolvable:$true] %s16_s13 }
   0x4   :  { %p286_p1 = scmp.lt.u32.totalorder %s282_s16, %s432_s0 }
   0x6   :  { %p288_p2 = pnand %p286_p1, %p283_p0 }
   0x8   :  { %291 = shalt.err (!%p288_p2)
}
   0x9   :  { %s292_s21 = scalar_lea.vmem %s17_s13, 128  ;;  %p297_p4 = scmp.lt.s32.totalorder %s17_s13, %s17_s13 }
   0xa   :  { %p293_p3 = scmp.ne.s32.totalorder %s17_s13, %s292_s21  ;;  %p298_p5 = scmp.lt.s32.totalorder %s292_s21, %s292_s21 }
   0xc   :  { %p299_p6 = por %p298_p5, %p297_p4 }
   0xe   :  { %p300_p7 = pnand %p299_p6, %p293_p3 }
  0x10   :  { %303 = shalt.err (!%p300_p7)
}
  0x11   :  { %s355_s22 = smov 16   ;;  %s356_s23 = smov 1  }
  0x12   :  { %22 = dma.hbm_to_vmem [thread:$0]  %s432_s0, 128, %s17_s13, [#allocation3], %s355_s22, %s355_s22, %s356_s23  }
  0x13   :  { %s357_s26 = smov [#allocation5]   ;;  %s304_s30 = scalar_lea.hbm %s433_s1, 1024 }
  0x14   :  { %s28_s27 = sshll.u32 %s357_s26, 4  ;;  %p305_p8 = scmp.ne.s32.totalorder %s433_s1, %s304_s30  ;;  %s29_s27 = int_to_ptr.vmem [resolvable:$true] %s28_s27 }
  0x15   :  { %p308_p9 = scmp.lt.u32.totalorder %s304_s30, %s433_s1 }
  0x17   :  { %p310_p10 = pnand %p308_p9, %p305_p8 }
  0x19   :  { %313 = shalt.err (!%p310_p10)
}
  0x1a   :  { %s314_s8 = scalar_lea.vmem %s29_s27, 1024  ;;  %p319_p12 = scmp.lt.s32.totalorder %s29_s27, %s29_s27 }
  0x1b   :  { %p315_p11 = scmp.ne.s32.totalorder %s29_s27, %s314_s8  ;;  %p320_p13 = scmp.lt.s32.totalorder %s314_s8, %s314_s8 }
  0x1d   :  { %p321_p0 = por %p320_p13, %p319_p12 }
  0x1f   :  { %p322_p1 = pnand %p321_p0, %p315_p11 }
  0x21   :  { %325 = shalt.err (!%p322_p1)
}
  0x22   :  { %s358_s0 = smov 64   ;;  %s359_s9 = smov 4  }
  0x23   :  { %34 = dma.hbm_to_vmem [thread:$0]  %s433_s1, 1024, %s29_s27, [#allocation6], %s358_s0, %s358_s0, %s359_s9  }
  0x24   :  { %348 = dma.done.wait [#allocation3], 128  }
  0x25   :  { %349 = vsyncadd [#allocation3], 4294967168 }
  0x26   :  { %350 = dma.done.wait [#allocation6], 1024  }
  0x27   :  { %351 = vsyncadd [#allocation6], 4294966272  ;;  %v360_v0 = vmov 0.0   ;;  %vm361_vm0 = vmmov 0   ;;  %v274_v1 = vld [vmem:[#allocation5] sm:$0xff]   ;;  %v275_v2 = vld [vmem:[#allocation5 + $0x8] sm:$0xff]  }
  0x28   :  { %245 = vmatprep.subr.bf16.mxu0 %v360_v0  ;;  %261 = vmatprep.mubr.msk.bf16.mxu0 %vm361_vm0, %v360_v0  ;;  %v276_v3 = vld [vmem:[#allocation5 + $0x10] sm:$0xff]   ;;  %v44_v4 = vld [vmem:[#allocation2] sm:$0x1]  ;;  %v45_v5 = vld [vmem:[#allocation2 + $0x1] sm:$0x1]  ;;  %vm100_vm1 = vcmask 1041409  }
  0x29   :  { %246 = vmatpush3.bf16.msra.mxu0 %v274_v1  ;;  %v46_v6 = vld [vmem:[#allocation2 + $0x2] sm:$0x1]  ;;  %v47_v7 = vld [vmem:[#allocation2 + $0x3] sm:$0x1]  ;;  %v48_v8 = vld [vmem:[#allocation2 + $0x4] sm:$0x1]  ;;  %v68_v10 = vpack.c.bf16 %v44_v4, %v44_v4  ;;  %v69_v11 = vpack.c.bf16 %v45_v5, %v45_v5 }
  0x2a   :  { %247 = vmatprep.subr.bf16.mxu0 %v360_v0  ;;  %v49_v9 = vld [vmem:[#allocation2 + $0x5] sm:$0x1]  ;;  %v70_v12 = vpack.c.bf16 %v46_v6, %v46_v6  ;;  %v50_v14 = vld [vmem:[#allocation2 + $0x6] sm:$0x1]  ;;  %v71_v15 = vpack.c.bf16 %v47_v7, %v47_v7  ;;  %v72_v16 = vpack.c.bf16 %v48_v8, %v48_v8  ;;  %v51_v18 = vld [vmem:[#allocation2 + $0x7] sm:$0x1] }
  0x2b   :  { %v277_v13 = vld [vmem:[#allocation5 + $0x18] sm:$0xff]   ;;  %v73_v17 = vpack.c.bf16 %v49_v9, %v49_v9  ;;  %v74_v19 = vpack.c.bf16 %v50_v14, %v50_v14  ;;  %v91_v20 = vunpack.c.l.b16 %v68_v10  ;;  %v92_v21 = vunpack.c.l.b16 %v69_v11  ;;  %v278_v27 = vld [vmem:[#allocation5 + $0x20] sm:$0xff]   ;;  %v279_v37 = vld [vmem:[#allocation5 + $0x28] sm:$0xff]   ;;  %s362_s13 = smov [#allocation7]  }
  0x2c   :  { %v93_v22 = vunpack.c.l.b16 %v70_v12  ;;  %v94_v23 = vunpack.c.l.b16 %v71_v15  ;;  %v95_v24 = vunpack.c.l.b16 %v72_v16  ;;  %vm103_vm2 = vcmask 1042434   ;;  %v280_v42 = vld [vmem:[#allocation5 + $0x30] sm:$0xff]   ;;  %v281_v45 = vld [vmem:[#allocation5 + $0x38] sm:$0xff]   ;;  %s217_s14 = sshll.u32 %s362_s13, 4  ;;  %s218_s14 = int_to_ptr.vmem [resolvable:$true] %s217_s14 }
  0x2d   :  { %248 = vmatpush3.bf16.msra.mxu0 %v275_v2  ;;  %v96_v25 = vunpack.c.l.b16 %v73_v17  ;;  %v99_v26 = vrot.slane %v92_v21, 7  ;;  %vm106_vm3 = vcmask 1043459   ;;  %v75_v28 = vpack.c.bf16 %v51_v18, %v51_v18  ;;  %v227_v48 = vld [vmem:[%s434_s2] ss:$0 sm:$0xff]  ;;  %s326_s15 = scalar_lea.vmem %s218_s14, 128  ;;  %p331_p3 = scmp.lt.s32.totalorder %s218_s14, %s218_s14 }
  0x2e   :  { %249 = vmatprep.subr.bf16.mxu0 %v360_v0  ;;  %v102_v29 = vrot.slane %v93_v22, 6  ;;  %v105_v30 = vrot.slane %v94_v23, 5  ;;  %v108_v31 = vrot.slane %v95_v24, 4  ;;  %v97_v32 = vunpack.c.l.b16 %v74_v19  ;;  %p327_p2 = scmp.ne.s32.totalorder %s218_s14, %s326_s15  ;;  %p332_p4 = scmp.lt.s32.totalorder %s326_s15, %s326_s15 }
  0x2f   :  { %v101_v33 = vsel %vm100_vm1, %v99_v26, %v91_v20  ;;  %vm109_vm4 = vcmask 1044484   ;;  %v111_v35 = vrot.slane %v96_v25, 3  ;;  %vm112_vm5 = vcmask 1045509  }
  0x30   :  { %v104_v34 = vsel %vm103_vm2, %v102_v29, %v101_v33  ;;  %v98_v38 = vunpack.c.l.b16 %v75_v28  ;;  %v114_v40 = vrot.slane %v97_v32, 2  ;;  %vm115_vm6 = vcmask 1046534   ;;  %p333_p5 = por %p332_p4, %p331_p3 }
  0x31   :  { %250 = vmatpush3.bf16.msra.mxu0 %v276_v3  ;;  %v107_v36 = vsel %vm106_vm3, %v105_v30, %v104_v34  ;;  %vm118_vm7 = vcmask 1047559  }
  0x32   :  { %251 = vmatprep.subr.bf16.mxu0 %v360_v0  ;;  %v110_v39 = vsel %vm109_vm4, %v108_v31, %v107_v36  ;;  %v117_v43 = vrot.slane %v98_v38, 1  ;;  %p334_p6 = pnand %p333_p5, %p327_p2 }
  0x33   :  { %v113_v41 = vsel %vm112_vm5, %v111_v35, %v110_v39 }
  0x34   :  { %v116_v44 = vsel %vm115_vm6, %v114_v40, %v113_v41 }
  0x35   :  { %252 = vmatpush3.bf16.msra.mxu0 %v277_v13  ;;  %v119_v46 = vsel %vm118_vm7, %v117_v43, %v116_v44 }
  0x36   :  { %253 = vmatprep.subr.bf16.mxu0 %v360_v0  ;;  %v120_v47 = vpack.c.b16 %v119_v46, %v119_v46 }
  0x39   :  { %254 = vmatpush3.bf16.msra.mxu0 %v278_v27 }
  0x3a   :  { %255 = vmatprep.subr.bf16.mxu0 %v360_v0 }
  0x3d   :  { %256 = vmatpush3.bf16.msra.mxu0 %v279_v37 }
  0x3e   :  { %257 = vmatprep.subr.bf16.mxu0 %v360_v0 }
  0x41   :  { %258 = vmatpush3.bf16.msra.mxu0 %v280_v42 }
  0x42   :  { %259 = vmatprep.subr.bf16.mxu0 %v360_v0 }
  0x45   :  { %260 = vmatpush3.bf16.msra.mxu0 %v281_v45 }
  0x48   :  { %262 = vmatmul.mubr.bf16.vlgmr.msra.gmra.mrb[0].mxu0 %v120_v47 }
 0x11b   :  { %v204_v49 = vpop.f32.mrb[0].mxu0 }
 0x11c   :  { %v205_v50 = vadd.f32 %v227_v48, %v204_v49  ;;  %v263_v51 = vpop.f32.mrb[1].mxu0 }
 0x11d   :  { %v207_v52 = vpop.f32.mrb[2].mxu0 }
 0x11e   :  { %210 = vst [vmem:[#allocation7] sm:$0xff] %v205_v50  ;;  %v264_v53 = vpop.f32.mrb[3].mxu0 }
 0x11f   :  { %337 = shalt.err (!%p334_p6)
}
 0x120   :  { %s338_s2 = scalar_lea.hbm %s435_s3, 128 }
 0x121   :  { %p339_p7 = scmp.ne.s32.totalorder %s435_s3, %s338_s2  ;;  %p342_p8 = scmp.lt.u32.totalorder %s338_s2, %s435_s3 }
 0x123   :  { %p344_p9 = pnand %p342_p8, %p339_p7 }
 0x125   :  { %347 = shalt.err (!%p344_p9)
}
 0x126   :  { %220 = dma.vmem_to_hbm [thread:$0]  %s218_s14, 128, %s435_s3, [#allocation4]  }
 0x127   :  { %352 = dma.done.wait [#allocation4], 128  }
 0x128   :  { %353 = vsyncadd [#allocation4], 4294967168 }
 0x129   :  { %224 = vsyncpa [#allocation3], 1 }
 0x12a   :  { %225 = vsyncpa [#allocation6], 1 }
 0x12b   :  { %226 = vsyncpa [#allocation4], 1 }

</bundles_post_ra>
